<compile_context>
chip_gen: v5e
topology: v5e:2x2
jax: 0.10.0
libtpu: 0.0.40
codegen_flags: <defaults>
</compile_context>

<pallas_src>
import functools
import math

import jax
import jax.numpy as jnp
import numpy as np
from jax.experimental import pallas as pl
from jax.experimental.pallas import tpu as pltpu


def _self_attn_kernel(x_ref, xt_ref, wqv_ref, wk_ref, watt_ref, o_ref,
                      *, cmid, inv_scale):
    # x_ref, xt_ref : (Cin, T)    channel-major activation tile (xt = spatially
    #                             transposed image, positionally aligned with x)
    # wqv_ref       : (2*Cmid, Cin)  fused [Wq; Wv] projection
    # wk_ref        : (Cmid, Cin)
    # watt_ref      : (Cout, Cmid)
    # o_ref         : (Cout, T)   lane-dense output tile
    x = x_ref[...]
    xt = xt_ref[...]

    # Fused q/v projection: one MXU push, then cheap static sublane slices.
    qv = jnp.dot(wqv_ref[...], x, preferred_element_type=jnp.float32)   # (2*Cmid, T)
    q = qv[:cmid, :]
    v = qv[cmid:, :]

    # key^T (spatial): project the pre-transposed activation stream.
    kt = jnp.dot(wk_ref[...], xt, preferred_element_type=jnp.float32)   # (Cmid, T)

    num = (q * kt) * inv_scale                                          # (Cmid, T)

    # Softmax over the projected-channel dim (axis 0 here == PyTorch dim=1).
    m = jnp.max(num, axis=0, keepdims=True)
    e = jnp.exp(num - m)
    # exact reciprocal: keeps 1e-5 verification tolerance (approx=True ~1e-3).
    s = e * pl.reciprocal(jnp.sum(e, axis=0, keepdims=True), approx=False)

    sv = s * v                                                          # (Cmid, T)
    out = jnp.dot(watt_ref[...], sv, preferred_element_type=jnp.float32)  # (Cout, T)
    o_ref[...] = out.astype(o_ref.dtype)


def self_attention_pallas(x, wk, wq, wv, watt, *, spatial_tile=2048):
    """x: (B, Cin, H, W) float32 NCHW.
    wk/wq/wv: (Cin, Cmid); watt: (Cmid, Cout)  (same convention as the ref)."""
    B, Cin, H, W = x.shape
    assert H == W, "PyTorch forward's `query * key.transpose(2,3)` requires H == W"
    Cmid = wk.shape[1]
    Cout = watt.shape[1]
    HW = H * W

    # Channel-major activations. x_cm is a FREE view of NCHW (no data movement);
    # xt_cm is the single remaining layout op (feeds key^T spatial transpose).
    x_cm = x.reshape(B, Cin, HW)
    xt_cm = jnp.transpose(x, (0, 1, 3, 2)).reshape(B, Cin, HW)

    # Weights stored transposed for (C_out, C_in) @ (C_in, HW) matmuls;
    # q and v fused into one projection weight.
    w_qv = jnp.concatenate([wq.T, wv.T], axis=0)   # (2*Cmid, Cin)
    wk_t = wk.T                                    # (Cmid, Cin)
    watt_t = watt.T                                # (Cout, Cmid)

    # Spatial tiling: multiple-of-128 tiles for real image sizes, single tile
    # (full HW, still lane-dense) for small inputs.
    t = min(spatial_tile, HW)
    if HW % t != 0:
        t = HW
    n_s = HW // t

    inv_scale = 1.0 / math.sqrt(float(W))          # key_dimension = key.shape[-1] = W
    kernel = functools.partial(_self_attn_kernel, cmid=Cmid, inv_scale=inv_scale)

    out_cm = pl.pallas_call(
        kernel,
        out_shape=jax.ShapeDtypeStruct((B, Cout, HW), jnp.float32),
        grid_spec=pltpu.PrefetchScalarGridSpec(
            num_scalar_prefetch=0,
            grid=(B, n_s),
            in_specs=[
                pl.BlockSpec((pl.Squeezed(), Cin, t), lambda b, s: (b, 0, s)),
                pl.BlockSpec((pl.Squeezed(), Cin, t), lambda b, s: (b, 0, s)),
                pl.BlockSpec((2 * Cmid, Cin), lambda b, s: (0, 0)),
                pl.BlockSpec((Cmid, Cin), lambda b, s: (0, 0)),
                pl.BlockSpec((Cout, Cmid), lambda b, s: (0, 0)),
            ],
            out_specs=pl.BlockSpec((pl.Squeezed(), Cout, t), lambda b, s: (b, 0, s)),
        ),
        compiler_params=pltpu.CompilerParams(
            dimension_semantics=("parallel", "parallel")),
    )(x_cm, xt_cm, w_qv, wk_t, watt_t)

    # Free view back to NCHW.
    return out_cm.reshape(B, Cout, H, W)


def self_attention_ref(x, wk, wq, wv, watt):
    """Pure-JAX reference mirroring the PyTorch forward (for verification)."""
    def conv1x1(inp, w):  # w: (Cin_w, Cout_w), inp NCHW
        return jnp.einsum('bchw,cd->bdhw', inp, w)
    key = conv1x1(x, wk)
    query = conv1x1(x, wq)
    value = conv1x1(x, wv)
    key_dim = float(key.shape[-1])
    key_t = jnp.transpose(key, (0, 1, 3, 2))
    num = query * key_t
    s = jax.nn.softmax(num / jnp.sqrt(key_dim), axis=1)   # F.softmax default dim=1 for 4-D
    out = s * value
    return conv1x1(out, watt)


if __name__ == "__main__":
    # Module hyperparams: in_channels=4, out_channels=4, ratio=2 -> mid channels 2
    B, Cin, H, W = 2, 4, 16, 16
    ratio = 2
    Cmid = Cin // ratio
    Cout = 4

    key0 = jax.random.PRNGKey(0)
    kx, kk, kq, kv, ka = jax.random.split(key0, 5)

    x = jax.random.normal(kx, (B, Cin, H, W), dtype=jnp.float32)
    # deterministic weight init (stand-in for nn.Conv2d kaiming init), stored as (Cin, Cout)
    wk = jax.random.normal(kk, (Cin, Cmid), dtype=jnp.float32) / math.sqrt(Cin)
    wq = jax.random.normal(kq, (Cin, Cmid), dtype=jnp.float32) / math.sqrt(Cin)
    wv = jax.random.normal(kv, (Cin, Cmid), dtype=jnp.float32) / math.sqrt(Cin)
    watt = jax.random.normal(ka, (Cmid, Cout), dtype=jnp.float32) / math.sqrt(Cmid)

    out = self_attention_pallas(x, wk, wq, wv, watt)
    out = jax.block_until_ready(out)

    ref = jax.block_until_ready(self_attention_ref(x, wk, wq, wv, watt))
    np.testing.assert_allclose(np.asarray(out), np.asarray(ref), rtol=1e-5, atol=1e-5)

    print("KERNEL_OK")
</pallas_src>

<mosaic_0001>
module attributes {stable_mosaic.version = 11 : i64} {
  func.func @_self_attn_kernel(%arg0: i32, %arg1: i32, %arg2: memref<1x4x256xf32, #tpu.memory_space<vmem>>, %arg3: memref<1x4x256xf32, #tpu.memory_space<vmem>>, %arg4: memref<4x4xf32, #tpu.memory_space<vmem>>, %arg5: memref<2x4xf32, #tpu.memory_space<vmem>>, %arg6: memref<4x2xf32, #tpu.memory_space<vmem>>, %arg7: memref<1x4x256xf32, #tpu.memory_space<vmem>>) attributes {dimension_semantics = [#tpu.dimension_semantics<parallel>, #tpu.dimension_semantics<parallel>], iteration_bounds = array<i64: 2, 1>, scalar_prefetch = 0 : i64, scratch_operands = 0 : i64, tpu.core_type = #tpu.core_type<tc>, window_params = [{transform_indices = @transform_0, window_bounds = array<i64: 1, 4, 256>}, {transform_indices = @transform_1, window_bounds = array<i64: 1, 4, 256>}, {pipeline_mode = #tpu.pipeline_mode<synchronous>, transform_indices = @transform_2, window_bounds = array<i64: 4, 4>}, {pipeline_mode = #tpu.pipeline_mode<synchronous>, transform_indices = @transform_3, window_bounds = array<i64: 2, 4>}, {pipeline_mode = #tpu.pipeline_mode<synchronous>, transform_indices = @transform_4, window_bounds = array<i64: 4, 2>}, {transform_indices = @transform_5, window_bounds = array<i64: 1, 4, 256>}]} {
    %c0 = arith.constant 0 : index
    %c0_0 = arith.constant 0 : index
    %c0_1 = arith.constant 0 : index
    %0 = vector.load %arg2[%c0, %c0_0, %c0_1] : memref<1x4x256xf32, #tpu.memory_space<vmem>>, vector<1x4x256xf32>
    %1 = vector.shape_cast %0 : vector<1x4x256xf32> to vector<4x256xf32>
    %c0_2 = arith.constant 0 : index
    %c0_3 = arith.constant 0 : index
    %c0_4 = arith.constant 0 : index
    %2 = vector.load %arg3[%c0_2, %c0_3, %c0_4] : memref<1x4x256xf32, #tpu.memory_space<vmem>>, vector<1x4x256xf32>
    %3 = vector.shape_cast %2 : vector<1x4x256xf32> to vector<4x256xf32>
    %c0_5 = arith.constant 0 : index
    %c0_6 = arith.constant 0 : index
    %4 = vector.load %arg4[%c0_5, %c0_6] : memref<4x4xf32, #tpu.memory_space<vmem>>, vector<4x4xf32>
    %cst = arith.constant dense<0.000000e+00> : vector<4x256xf32>
    %5 = tpu.matmul %4, %1, %cst {dimension_numbers = #tpu.dot_dimension_numbers<[1], [0], [0], [1], [0, 0, 1, 1], [], []>} : vector<4x4xf32>, vector<4x256xf32>, vector<4x256xf32> -> vector<4x256xf32>
    %6 = vector.extract_strided_slice %5 {offsets = [0, 0], sizes = [2, 256], strides = [1, 1]} : vector<4x256xf32> to vector<2x256xf32>
    %7 = vector.extract_strided_slice %5 {offsets = [2, 0], sizes = [2, 256], strides = [1, 1]} : vector<4x256xf32> to vector<2x256xf32>
    %c0_7 = arith.constant 0 : index
    %c0_8 = arith.constant 0 : index
    %8 = vector.load %arg5[%c0_7, %c0_8] : memref<2x4xf32, #tpu.memory_space<vmem>>, vector<2x4xf32>
    %cst_9 = arith.constant dense<0.000000e+00> : vector<2x256xf32>
    %9 = tpu.matmul %8, %3, %cst_9 {dimension_numbers = #tpu.dot_dimension_numbers<[1], [0], [0], [1], [0, 0, 1, 1], [], []>} : vector<2x4xf32>, vector<4x256xf32>, vector<2x256xf32> -> vector<2x256xf32>
    %10 = arith.mulf %6, %9 : vector<2x256xf32>
    %cst_10 = arith.constant 2.500000e-01 : f32
    %11 = vector.broadcast %cst_10 : f32 to vector<2x256xf32>
    %12 = arith.mulf %10, %11 : vector<2x256xf32>
    %cst_11 = arith.constant dense<0xFF800000> : vector<256xf32>
    %13 = vector.multi_reduction <maximumf>, %12, %cst_11 [0] : vector<2x256xf32> to vector<256xf32>
    %14 = vector.shape_cast %13 : vector<256xf32> to vector<1x256xf32>
    %15 = vector.broadcast %14 : vector<1x256xf32> to vector<2x256xf32>
    %16 = arith.subf %12, %15 : vector<2x256xf32>
    %17 = math.exp %16 : vector<2x256xf32>
    %cst_12 = arith.constant dense<0.000000e+00> : vector<256xf32>
    %18 = vector.multi_reduction <add>, %17, %cst_12 [0] : vector<2x256xf32> to vector<256xf32>
    %19 = vector.shape_cast %18 : vector<256xf32> to vector<1x256xf32>
    %20 = tpu.reciprocal %19 : vector<1x256xf32> -> vector<1x256xf32>
    %21 = vector.broadcast %20 : vector<1x256xf32> to vector<2x256xf32>
    %22 = arith.mulf %17, %21 : vector<2x256xf32>
    %23 = arith.mulf %22, %7 : vector<2x256xf32>
    %c0_13 = arith.constant 0 : index
    %c0_14 = arith.constant 0 : index
    %24 = vector.load %arg6[%c0_13, %c0_14] : memref<4x2xf32, #tpu.memory_space<vmem>>, vector<4x2xf32>
    %cst_15 = arith.constant dense<0.000000e+00> : vector<4x256xf32>
    %25 = tpu.matmul %24, %23, %cst_15 {dimension_numbers = #tpu.dot_dimension_numbers<[1], [0], [0], [1], [0, 0, 1, 1], [], []>} : vector<4x2xf32>, vector<2x256xf32>, vector<4x256xf32> -> vector<4x256xf32>
    %c0_16 = arith.constant 0 : index
    %c0_17 = arith.constant 0 : index
    %c0_18 = arith.constant 0 : index
    %26 = vector.load %arg7[%c0_16, %c0_17, %c0_18] : memref<1x4x256xf32, #tpu.memory_space<vmem>>, vector<1x4x256xf32>
    %27 = vector.shape_cast %26 : vector<1x4x256xf32> to vector<4x256xf32>
    %28 = vector.shape_cast %25 : vector<4x256xf32> to vector<1x4x256xf32>
    tpu.vector_store %arg7[%c0_16, %c0_17, %c0_18], %28 {strides = array<i32>} : memref<1x4x256xf32, #tpu.memory_space<vmem>>, vector<1x4x256xf32>,
    return
  }
  func.func @transform_0(%arg0: i32, %arg1: i32) -> (i32, i32, i32) {
    %c0_i32 = arith.constant 0 : i32
    %c0_i32_0 = arith.constant 0 : i32
    return %arg0, %c0_i32, %arg1 : i32, i32, i32
  }
  func.func @transform_1(%arg0: i32, %arg1: i32) -> (i32, i32, i32) {
    %c0_i32 = arith.constant 0 : i32
    %c0_i32_0 = arith.constant 0 : i32
    return %arg0, %c0_i32, %arg1 : i32, i32, i32
  }
  func.func @transform_2(%arg0: i32, %arg1: i32) -> (i32, i32) {
    %c0_i32 = arith.constant 0 : i32
    %c0_i32_0 = arith.constant 0 : i32
    %c0_i32_1 = arith.constant 0 : i32
    return %c0_i32, %c0_i32_0 : i32, i32
  }
  func.func @transform_3(%arg0: i32, %arg1: i32) -> (i32, i32) {
    %c0_i32 = arith.constant 0 : i32
    %c0_i32_0 = arith.constant 0 : i32
    %c0_i32_1 = arith.constant 0 : i32
    return %c0_i32, %c0_i32_0 : i32, i32
  }
  func.func @transform_4(%arg0: i32, %arg1: i32) -> (i32, i32) {
    %c0_i32 = arith.constant 0 : i32
    %c0_i32_0 = arith.constant 0 : i32
    %c0_i32_1 = arith.constant 0 : i32
    return %c0_i32, %c0_i32_0 : i32, i32
  }
  func.func @transform_5(%arg0: i32, %arg1: i32) -> (i32, i32, i32) {
    %c0_i32 = arith.constant 0 : i32
    %c0_i32_0 = arith.constant 0 : i32
    return %arg0, %c0_i32, %arg1 : i32, i32, i32
  }
}

</mosaic_0001>

<bundles_post_ra>
// kernel: tpu_custom_call.1
= control target key start
LH: loop header
LB: loop body
LE: loop exit
PB: predicated region body
PF: predicated region fallthrough
CT: control target
= control target key end

     0   :  { %10 = vsyncpa [#allocation3], 0  ;;  %s1127_s0 = inlined_call_operand.hbm [shape: f32[2,4,256], index: 0, kind: input, shape index: {}]   ;;  %s1128_s1 = inlined_call_operand.hbm [shape: f32[2,4,256], index: 1, kind: input, shape index: {}]   ;;  %s1129_s2 = inlined_call_operand.vmem [shape: f32[4,4], index: 2, kind: input, shape index: {}]   ;;  %s1130_s3 = inlined_call_operand.vmem [shape: f32[2,4], index: 3, kind: input, shape index: {}]   ;;  %s1131_s4 = inlined_call_operand.vmem [shape: f32[4,2], index: 4, kind: input, shape index: {}]   ;;  %s1132_s5 = inlined_call_operand.hbm [shape: f32[2,4,256], index: 5, kind: output, shape index: {}]  }
   0x1   :  { %12 = vsyncpa [#allocation3 + $0x1], 0 }
   0x2   :  { %13 = vsyncpa [#allocation6], 0 }
   0x3   :  { %15 = vsyncpa [#allocation6 + $0x1], 0 }
   0x4   :  { %16 = vsyncpa [#allocation4], 0 }
   0x5   :  { %18 = vsyncpa [#allocation4 + $0x1], 0  ;;  %s966_s18 = smov 0   ;;  %s968_s19 = smov 0  }
   0x6   :  { %s970_s20 = smov 0   ;;  %s972_s21 = smov 0  }
   0x7   :  { %s974_s22 = smov 0   ;;  %s976_s23 = smov 0  }
   0x8 LB: > { %1135 = sst [smem:[#allocation11_spill]] %s930_s22  ;;  %s679_s24 = sadd.s32 4294967295, %s934_s23   ;;  %s934_s23 = sphi %s976_s23, %s24_s23   ;;  %s930_s22 = sphi %s974_s22, %s1142_s22   ;;  %s926_s21 = sphi %s972_s21, %s1141_s21   ;;  %s922_s20 = sphi %s970_s20, %s1145_s20   ;;  %s918_s19 = sphi %s968_s19, %s1144_s19   ;;  %s914_s18 = sphi %s966_s18, %s1143_s18  }
   0x9   : > { %s680_s25 = sadd.s32 4294967294, %s934_s23   ;;  %s36_s26 = sadd.s32 1, %s930_s22 }
   0xa   : > { %s45_s27 = sadd.s32 1, %s922_s20  ;;  %p38_p0 = scmp.ge.s32.totalorder %s36_s26, 2 }
   0xb   : > { %p52_p1 = scmp.ne.s32.totalorder %s922_s20, %s918_s19  ;;  %p53_p2 = scmp.eq.s32.totalorder %s934_s23, 0 }
   0xc   : > { %p58_p3 = scmp.ne.s32.totalorder %s918_s19, %s914_s18  ;;  %s1147_s26 = smov (%p38_p0, %s36_s26), 0 }
   0xd   : > { %1136 = sst [smem:[#allocation12_spill]] %s1147_s26  ;;  %p1007_p4 = por %p53_p2, %p52_p1 }
   0xe   : > { %p59_p5 = scmp.eq.s32.totalorder %s679_s24, 0  ;;  %s40_s29 = ssub.s32 %s930_s22, %s1147_s26 }
   0xf   : > { %p175_p6 = scmp.eq.s32.totalorder %s679_s24, 1  ;;  %p43_p7 = scmp.eq.s32.totalorder %s40_s29, 0 }
  0x10   : > { %p1013_p8 = por %p59_p5, %p58_p3  ;;  %p181_p10 = scmp.eq.s32.totalorder %s680_s25, 1 }
  0x11   : > { %p1017_p9 = por %p175_p6, %p52_p1  ;;  %p682_p12 = scmp.ge.s32.totalorder %s934_s23, 2 }
  0x12   : > { %s1022_s7 = scalar_select %p43_p7, %s922_s20, %s45_s27  }
  0x13   : > { %p1024_p11 = por %p181_p10, %p58_p3  ;;  %p730_p13 = scmp.lt.s32.totalorder %s934_s23, 2 }
  0x14   : > { %s210_s9 = sand.u32 1, %s922_s20   ;;  %s710_s11 = sshll.u32 %s930_s22, 3 }
  0x15   : > { %s683_s10 = sshll.u32 %s210_s9, 3  ;;  %s221_s14 = scalar_lea.hbm %s1127_s0, %s710_s11 }
  0x16   : > { %s214_s15 = scalar_lea.vmem [#allocation2], %s683_s10  ;;  %s223_s17 = sshll.u32 %s221_s14, 4  ;;  %s224_s17 = int_to_ptr.hbm [resolvable:$true] %s223_s17 }
  0x17   : > { %s225_s16 = sshll.u32 %s214_s15, 4  ;;  %p720_p0 = pnand %p730_p13, %p1007_p4  ;;  %s226_s16 = int_to_ptr.vmem [resolvable:$true] %s225_s16 }
  0x18   : > { %p689_p1 = scmp.ge.s32.totalorder %s934_s23, 1  ;;  %p252_p2 = scmp.lt.s32.totalorder %s934_s23, 3 }
  0x19   : > { %s211_s24 = scalar_lea.sflag [#allocation3], %s210_s9  ;;  %s243_s29 = scalar_lea.hbm %s1128_s1, %s710_s11 }
  0x1a   : > { %722 = dma.hbm_to_vmem [thread:$0]  (!%p720_p0), %s224_s17, 128, %s226_s16, %s211_s24  }
  0x1b   : > { %p253_p3 = pnand %p689_p1, %p252_p2  ;;  %s236_s26 = scalar_lea.vmem [#allocation5], %s683_s10 }
  0x1c   : > { %s247_s22 = sshll.u32 %s236_s26, 4  ;;  %s245_s12 = sshll.u32 %s243_s29, 4  ;;  %s248_s22 = int_to_ptr.vmem [resolvable:$true] %s247_s22  ;;  %s246_s12 = int_to_ptr.hbm [resolvable:$true] %s245_s12 }
  0x1d   : > { %s233_s13 = scalar_lea.sflag [#allocation6], %s210_s9  ;;  %256 = sbr.rel (%p253_p3) target bundleno = 383 (0x17f), region = 40 }
  0x1e   : > { %725 = dma.hbm_to_vmem [thread:$0]  (!%p720_p0), %s246_s12, 128, %s248_s22, %s233_s13  }
  0x1f   : > { %s1043_s28 = sand.u32 (!%p253_p3), 1, %s918_s19  }
  0x20   : > { %s1046_s14 = sshll.u32 (!%p253_p3), %s1043_s28, 3  ;;  %s259_s15 = scalar_lea.sflag (!%p253_p3), [#allocation3], %s1043_s28 }
  0x21   : > { %s262_s16 = scalar_lea.vmem (!%p253_p3), [#allocation2], %s1046_s14 }
  0x22   : > { %901 = dma.done.wait (%p1013_p8), %s259_s15, 128  }
  0x23   : > { %903 = vsyncadd (%p1013_p8), %s259_s15, 4294967168  ;;  %s269_s22 = scalar_lea.sflag [#allocation6], %s1043_s28  ;;  %s272_s26 = scalar_lea.vmem [#allocation5], %s1046_s14 }
  0x24   : > { %905 = dma.done.wait (%p1013_p8), %s269_s22, 128  }
  0x25   : > { %907 = vsyncadd (%p1013_p8), %s269_s22, 4294967168  ;;  %v308_v0 = vld [vmem:[%s262_s16] sm:$0xff]  ;;  %v309_v1 = vld [vmem:[%s272_s26] sm:$0xff]  ;;  %vm319_vm0 = vcmask 1043456   ;;  %vm315_vm1 = vcmask 31744   ;;  %vm420_vm2 = vcmask 1041408  }
  0x26   : > { %312 = vst [vmem:[#allocation1] ss:$2 sm:$0xff] %v308_v0  ;;  %v310_v2 = vld [vmem:[%s1129_s2] sm:$0xf]  ;;  %vm494_vm11 = vcmask 15360   ;;  %s712_s25 = sshll.u32 %s926_s21, 3 }
  0x27   : > { %v364_v5 = vld [vmem:[%s1130_s3] sm:$0x3]  ;;  %s564_s12 = scalar_lea.hbm %s1132_s5, %s712_s25  ;;  %s304_s13 = scalar_lea.vmem [#allocation7], %s1046_s14 }
  0x28   : > { %s566_s15 = sshll.u32 %s304_s13, 4  ;;  %s568_s16 = sshll.u32 %s564_s12, 4  ;;  %s567_s15 = int_to_ptr.vmem [resolvable:$true] %s566_s15  ;;  %s569_s16 = int_to_ptr.hbm [resolvable:$true] %s568_s16 }
  0x29   : > { %s551_s22 = scalar_lea.sflag [#allocation4], %s1043_s28  ;;  %s862_s26 = sshra.s32 %s569_s16, 4  ;;  %s863_s26 = int_to_ptr.hbm [resolvable:$true] %s862_s26 }
  0x2a   : > { %s864_s21 = scalar_lea.hbm %s863_s26, 8  ;;  %s868_s10 = scalar_lea.hbm %s1132_s5, 16 }
  0x2b   : > { %p865_p4 = scmp.ne.s32.totalorder %s863_s26, %s864_s21  ;;  %p869_p7 = scmp.lt.s32.totalorder %s863_s26, %s1132_s5 }
  0x2c   : > { %p870_p8 = scmp.lt.s32.totalorder %s868_s10, %s864_s21 }
  0x2d   : > { %v313_v3 = vld.sshfl [vmem:[#allocation1] sm:$0xff pattern:$0x75316420]  ;;  %v314_v4 = vld.sshfl [vmem:[#allocation1 + $0x8] sm:$0xff pattern:$0x75316420]  ;;  %p866_p5 = pnand %p865_p4, %p1017_p9 }
  0x2e   : > { %366 = vst [vmem:[#allocation1] ss:$2 sm:$0xff] %v309_v1  ;;  %693 = vmatpush.msk.msra.mxu0 %vm319_vm0, %v313_v3  ;;  %695 = vmatpush.msk.msra.mxu1 %vm319_vm0, %v314_v4  ;;  %p871_p10 = por %p870_p8, %p869_p7 }
  0x2f   : > { %694 = vmatmul.msk.f32.vlgmr.msra.gmra.mxu0 %vm315_vm1, %v310_v2  ;;  %696 = vmatmul.msk.f32.vlgmr.msra.gmra.mxu1 %vm315_vm1, %v310_v2  ;;  %p867_p6 = pneg %p866_p5 }
  0x31   : > { %p872_p13 = pnand %p871_p10, %p867_p6 }
  0x35   : > { %v367_v6 = vld.sshfl [vmem:[#allocation1] sm:$0xff pattern:$0x75316420]  ;;  %v368_v7 = vld.sshfl [vmem:[#allocation1 + $0x8] sm:$0xff pattern:$0x75316420] }
  0x36   : > { %697 = vmatpush.msk.msra.mxu2 %vm319_vm0, %v367_v6  ;;  %699 = vmatpush.msk.msra.mxu3 %vm319_vm0, %v368_v7 }
  0x37   : > { %698 = vmatmul.msk.f32.vlgmr.msra.gmra.mxu2 %vm315_vm1, %v364_v5  ;;  %700 = vmatmul.msk.f32.vlgmr.msra.gmra.mxu3 %vm315_vm1, %v364_v5 }
  0xac   : > { %v1070_v8 = vpop.f32.mrf.mxu0  ;;  %v1072_v9 = vpop.f32.mrf.mxu1 }
  0xad   : > { %v487_v5 = vrot.slane %v1070_v8, 2 }
  0xba   : > { %v393_v10 = vpop.f32.mrf.mxu2  ;;  %v413_v11 = vpop.f32.mrf.mxu3 }
  0xbb   : > { %v416_v12 = vmul.f32 %v393_v10, %v1070_v8  ;;  %v417_v13 = vmul.f32 %v413_v11, %v1072_v9  ;;  %v488_v10 = vrot.slane %v1072_v9, 2 }
  0xbd   : > { %v418_v14 = vmul.f32 0.25, %v416_v12  ;;  %v419_v15 = vmul.f32 0.25, %v417_v13 }
  0xbf   : > { %v421_v16 = vsel %vm420_vm2, %v418_v14, -inf  ;;  %v428_v17 = vsel %vm420_vm2, %v419_v15, -inf }
  0xc0   : > { %v422_v18 = vrot.slane %v421_v16, 4  ;;  %v429_v19 = vrot.slane %v428_v17, 4 }
  0xc2   : > { %v423_v20 = vmax.f32 %v421_v16, %v422_v18  ;;  %v430_v21 = vmax.f32 %v428_v17, %v429_v19 }
  0xc4   : > { %v424_v22 = vrot.slane %v423_v20, 2  ;;  %v431_v23 = vrot.slane %v430_v21, 2 }
  0xc6   : > { %v425_v24 = vmax.f32 %v423_v20, %v424_v22  ;;  %v432_v25 = vmax.f32 %v430_v21, %v431_v23 }
  0xc8   : > { %v426_v26 = vrot.slane %v425_v24, 1  ;;  %v433_v27 = vrot.slane %v432_v25, 1 }
  0xca   : > { %v427_v28 = vmax.f32 %v425_v24, %v426_v26  ;;  %v434_v29 = vmax.f32 %v432_v25, %v433_v27 }
  0xcc   : > { %v435_v30 = vsub.f32 %v418_v14, %v427_v28  ;;  %v436_v31 = vsub.f32 %v419_v15, %v434_v29  ;;  %v493_v14 = vld [vmem:[%s1131_s4] sm:$0xf] }
  0xce   : > { %v437_v32 = vmul.f32 1.442695, %v435_v30  ;;  %v439_v33 = vmul.f32 1.442695, %v436_v31 }
  0xd0   : > { %780 = vpow2.f32 %v437_v32 }
  0xd1   : > { %782 = vpow2.f32 %v439_v33 }
  0xd6   : > { %v781_v34 = vpop.eup %780 }
  0xd7   : > { %v783_v35 = vpop.eup %782  ;;  %v441_v36 = vsel %vm420_vm2, %v781_v34, 0.0 }
  0xd8   : > { %v442_v37 = vrot.slane %v441_v36, 4  ;;  %v448_v38 = vsel %vm420_vm2, %v783_v35, 0.0 }
  0xd9   : > { %v449_v39 = vrot.slane %v448_v38, 4 }
  0xda   : > { %v443_v40 = vadd.f32 %v442_v37, %v441_v36 }
  0xdb   : > { %v450_v41 = vadd.f32 %v449_v39, %v448_v38 }
  0xdc   : > { %v444_v42 = vrot.slane %v443_v40, 2 }
  0xdd   : > { %v451_v43 = vrot.slane %v450_v41, 2 }
  0xde   : > { %v445_v44 = vadd.f32 %v444_v42, %v443_v40 }
  0xdf   : > { %v452_v45 = vadd.f32 %v451_v43, %v450_v41 }
  0xe0   : > { %v446_v46 = vrot.slane %v445_v44, 1 }
  0xe1   : > { %v453_v47 = vrot.slane %v452_v45, 1 }
  0xe2   : > { %v447_v48 = vadd.f32 %v446_v46, %v445_v44 }
  0xe3   : > { %v454_v49 = vadd.f32 %v453_v47, %v452_v45 }
  0xe4   : > { %784 = vrcp.f32 %v447_v48  ;;  %v466_v55 = vand.u32 2147483648, %v447_v48  ;;  %v464_v58 = vand.u32 2147483647, %v447_v48  ;;  %vm460_vm5 = vweird.f32 %v447_v48 }
  0xe5   : > { %786 = vrcp.f32 %v454_v49  ;;  %v480_v59 = vand.u32 2147483648, %v454_v49  ;;  %v478_v61 = vand.u32 2147483647, %v454_v49  ;;  %vm474_vm7 = vweird.f32 %v454_v49 }
  0xe6   : > { %v467_v63 = vor.u32 1.1754944e-38, %v466_v55  ;;  %vm465_vm8 = vcmp.eq.f32.partialorder %v464_v58, 8.507059e+37 }
  0xe7   : > { %v481_v2 = vor.u32 1.1754944e-38, %v480_v59  ;;  %vm479_vm10 = vcmp.eq.f32.partialorder %v478_v61, 8.507059e+37 }
  0xea   : > { %v785_v50 = vpop.eup %784 }
  0xeb   : > { %v787_v51 = vpop.eup %786  ;;  %v456_v52 = vmul.f32 %v785_v50, %v447_v48  ;;  %vm461_vm3 = vweird.f32 %v785_v50 }
  0xec   : > { %v470_v53 = vmul.f32 %v787_v51, %v454_v49  ;;  %vm475_vm4 = vweird.f32 %v787_v51  ;;  %vm462_vm6 = vmor %vm460_vm5, %vm461_vm3 }
  0xed   : > { %v457_v54 = vsub.f32 1.0, %v456_v52  ;;  %vm476_vm9 = vmor %vm474_vm7, %vm475_vm4 }
  0xee   : > { %v471_v56 = vsub.f32 1.0, %v470_v53 }
  0xef   : > { %v458_v57 = vmul.f32 %v785_v50, %v457_v54 }
  0xf0   : > { %v472_v60 = vmul.f32 %v787_v51, %v471_v56 }
  0xf1   : > { %v459_v62 = vadd.f32 %v785_v50, %v458_v57 }
  0xf2   : > { %v473_v0 = vadd.f32 %v787_v51, %v472_v60 }
  0xf3   : > { %v463_v1 = vsel %vm462_vm6, %v785_v50, %v459_v62 }
  0xf4   : > { %v468_v3 = vsel %vm465_vm8, %v467_v63, %v463_v1  ;;  %v477_v4 = vsel %vm476_vm9, %v787_v51, %v473_v0 }
  0xf5   : > { %v483_v6 = vmul.f32 %v781_v34, %v468_v3  ;;  %v482_v7 = vsel %vm479_vm10, %v481_v2, %v477_v4 }
  0xf6   : > { %v484_v11 = vmul.f32 %v783_v35, %v482_v7 }
  0xf7   : > { %v491_v12 = vmul.f32 %v487_v5, %v483_v6 }
  0xf8   : > { %v492_v13 = vmul.f32 %v488_v10, %v484_v11 }
  0xf9   : > { %701 = vmatpush.msk.msrb.mxu0 %vm420_vm2, %v491_v12 }
  0xfa   : > { %703 = vmatpush.msk.msrb.mxu1 %vm420_vm2, %v492_v13  ;;  %702 = vmatmul.msk.f32.vlgmr.msrb.gmra.mxu0 %vm494_vm11, %v493_v14 }
  0xfb   : > { %704 = vmatmul.msk.f32.vlgmr.msrb.gmra.mxu1 %vm494_vm11, %v493_v14 }
 0x177   : > { %v521_v9 = vpop.f32.mrf.mxu0 }
 0x178   : > { %v541_v8 = vpop.f32.mrf.mxu1 }
 0x179   : > { %v546_v15 = vrot.slane %v541_v8, 4 }
 0x17b   : > { %v547_v16 = vsel %vm319_vm0, %v521_v9, %v546_v15 }
 0x17c   : > { %549 = vst [vmem:[%s304_s13] sm:$0xff] %v547_v16 }
 0x17d   : > { %875 = shalt.err (!%p872_p13)
}
 0x17e   : > { %717 = dma.vmem_to_hbm [thread:$0]  (%p1017_p9), %s567_s15, 128, %s569_s16, %s551_s22  }
 0x17f PF: > { %s580_s28 = sand.u32 1, %s914_s18   ;;  %p727_p0 = pnand %p682_p12, %p1024_p11 }
 0x180   : > { %s581_s17 = scalar_lea.sflag [#allocation4], %s580_s28 }
 0x181   : > { %p728_p1 = pneg %p727_p0 }
 0x183   : > { %909 = dma.done.wait (%p728_p1), %s581_s17, 128  }
 0x184   : > { %911 = vsyncadd (%p728_p1), %s581_s17, 4294967168  ;;  %s24_s23 = sadd.s32 1, %s934_s23   ;;  %s1141_s21 = sld [smem:[#allocation11_spill]] }
 0x185   : > { %p21_p2 = scmp.ge.s32.totalorder %s24_s23, 4   ;;  %s1142_s22 = sld [smem:[#allocation12_spill]] }
 0x186   : > { %s1143_s18 = smov %s918_s19  ;;  %s1144_s19 = smov %s922_s20 }
 0x187   : > { %s1145_s20 = smov %s1022_s7  ;;  %23 = sbr.rel (!%p21_p2) target bundleno = 8 (0x8), region = 98 }
 0x18c   :  { %587 = vsyncpa [#allocation3], 1 }
 0x18d   :  { %589 = vsyncpa [#allocation3 + $0x1], 1 }
 0x18e   :  { %590 = vsyncpa [#allocation6], 1 }
 0x18f   :  { %592 = vsyncpa [#allocation6 + $0x1], 1 }
 0x190   :  { %593 = vsyncpa [#allocation4], 1 }
 0x191   :  { %595 = vsyncpa [#allocation4 + $0x1], 1 }

</bundles_post_ra>
